<compile_context>
chip_gen: v7x
topology: tpu7x:2x2x1
jax: 0.10.0
libtpu: 0.0.40
codegen_flags: <defaults>
</compile_context>

<pallas_src>
import functools

import numpy as np
import jax
import jax.numpy as jnp
from jax import lax
from jax.experimental import pallas as pl
from jax.experimental.pallas import tpu as pltpu


# --------------------------------------------------------------------------
# Kernel
# --------------------------------------------------------------------------
def _conv_group_fused_kernel(x_ref, w_ref, mask_ref, b_ref, out_ref, *, K, W_img):
    """One grid step processes B_blk images.

    x_ref:    (B_blk, C, S)   activations, spatial flattened on lanes (S = H*W)
    w_ref:    (C, K*K*C)      fused weights, columns ordered (tap, c_in)
    mask_ref: (K*K, C, S)     per-tap validity masks, pre-broadcast over C
    b_ref:    (C, 1)          fused bias (broadcasts over the lane axis)
    out_ref:  (B_blk, C, S)
    """
    B_blk, C, S = x_ref.shape
    pad = K // 2

    w = w_ref[...]        # (C, K*K*C)
    bias = b_ref[...]     # (C, 1)

    for b in range(B_blk):                       # static, tiny (1 or 2)
        x = x_ref[b]                             # (C, S), lane-dense
        tiles = []
        for kh in range(K):
            for kw in range(K):
                t = kh * K + kw
                off = (kh - pad) * W_img + (kw - pad)   # flat spatial shift
                shift = (-off) % S                       # jnp.roll convention
                if shift == 0:
                    xs = x
                else:
                    # shifted[:, s] == x[:, (s + off) mod S]; wrapped /
                    # out-of-image lanes are zeroed by the tap mask below.
                    xs = pltpu.roll(x, shift, axis=1)    # XLU vrot
                tiles.append(xs * mask_ref[t])           # (C, S) VPU multiply
        patch = jnp.concatenate(tiles, axis=0)           # (K*K*C, S)
        acc = jnp.dot(w, patch, preferred_element_type=jnp.float32)  # (C, S)
        out_ref[b] = (acc + bias).astype(out_ref.dtype)


# --------------------------------------------------------------------------
# Host-side (hoisted) parameter / mask preparation
# --------------------------------------------------------------------------
def prepare_conv_group(w1, b1, w2, b2, *, kernel_size, group_size, height, width):
    """Precompute fused weights/bias and per-tap masks (once per param set)."""
    w1 = np.asarray(w1, dtype=np.float32)
    b1 = np.asarray(b1, dtype=np.float32)
    w2 = np.asarray(w2, dtype=np.float32)
    b2 = np.asarray(b2, dtype=np.float32)

    G, K, _, Cg_in, Cg_out = w1.shape
    C = G * Cg_out
    assert K == kernel_size and Cg_in == group_size
    pad = K // 2
    S = height * width

    # ---- algebraic fusion: grouped KxK conv followed by 1x1 conv == one KxK conv
    # Block-diagonal full grouped weight: w1_full[kh, kw, ci, c_mid]
    # TODO(synk): for G >= 4 keep a grouped (block-diagonal) formulation instead
    # of densifying — the fused weight becomes mostly structural zeros on the MXU.
    w1_full = np.zeros((K, K, C, C), np.float32)
    for g in range(G):
        sl = slice(g * Cg_in, (g + 1) * Cg_in)
        w1_full[:, :, sl, sl] = w1[g]
    # Fold in the 1x1 conv: w_comb[kh, kw, ci, co] = sum_c w1_full[kh,kw,ci,c] * w2[c,co]
    w_comb = np.einsum('hkic,co->hkio', w1_full, w2)
    # Kernel layout: rows = c_out, columns ordered (tap, c_in) to match the stacked patch.
    w_stacked = np.ascontiguousarray(
        np.transpose(w_comb, (3, 0, 1, 2)).reshape(C, K * K * C))
    # Fused bias as (C, 1) column so it broadcasts over the lane (spatial) axis.
    b_col = (b1 @ w2 + b2).reshape(C, 1).astype(np.float32)

    # ---- per-tap validity masks (replace zero padding), pre-broadcast over channels
    masks = np.zeros((K * K, C, S), np.float32)
    for kh in range(K):
        for kw in range(K):
            dh, dw = kh - pad, kw - pad
            hh = np.arange(height)[:, None] + dh
            ww = np.arange(width)[None, :] + dw
            valid = (hh >= 0) & (hh < height) & (ww >= 0) & (ww < width)
            masks[kh * K + kw] = valid.astype(np.float32).reshape(S)[None, :]

    return {
        "w_stacked": jnp.asarray(w_stacked),
        "b_col": jnp.asarray(b_col),
        "masks": jnp.asarray(masks),
        "kernel_size": K,
        "channels": C,
        "height": height,
        "width": width,
    }


def _tensorcores_per_chip() -> int:
    try:
        kind = jax.devices()[0].device_kind.lower()
    except Exception:
        return 1
    return 2 if "v7" in kind else 1


# --------------------------------------------------------------------------
# Forward
# --------------------------------------------------------------------------
def conv_group_forward(x_nchw, prepared, *, images_per_step=None):
    """x_nchw: (B, C, H, W) float32. Returns (B, C, H, W)."""
    B, C, H, W = x_nchw.shape
    K = prepared["kernel_size"]
    assert C == prepared["channels"] and H == prepared["height"] and W == prepared["width"]
    S = H * W

    if images_per_step is None:
        # v7x: one image per grid step so both TensorCores work in parallel.
        # v5e/v6e: single TC -> single grid step over the whole (tiny) batch.
        images_per_step = 1 if _tensorcores_per_chip() >= 2 else B
    B_blk = max(1, min(images_per_step, B))
    while B % B_blk != 0:
        B_blk -= 1
    grid = (B // B_blk,)

    # NCHW kept; flatten spatial so the lane dim is H*W (free, contiguous reshape).
    x_flat = x_nchw.reshape(B, C, S)

    kernel = functools.partial(_conv_group_fused_kernel, K=K, W_img=W)

    out_flat = pl.pallas_call(
        kernel,
        out_shape=jax.ShapeDtypeStruct((B, C, S), x_nchw.dtype),
        grid_spec=pltpu.PrefetchScalarGridSpec(
            num_scalar_prefetch=0,
            grid=grid,
            in_specs=[
                pl.BlockSpec((B_blk, C, S), lambda i: (i, 0, 0)),
                pl.BlockSpec((C, K * K * C), lambda i: (0, 0)),
                pl.BlockSpec((K * K, C, S), lambda i: (0, 0, 0)),
                pl.BlockSpec((C, 1), lambda i: (0, 0)),
            ],
            out_specs=pl.BlockSpec((B_blk, C, S), lambda i: (i, 0, 0)),
        ),
        compiler_params=pltpu.CompilerParams(
            dimension_semantics=("parallel",)),
    )(x_flat, prepared["w_stacked"], prepared["masks"], prepared["b_col"])

    return out_flat.reshape(B, C, H, W)


# --------------------------------------------------------------------------
# Pure-JAX reference (matches PyTorch semantics)
# --------------------------------------------------------------------------
def _reference(x_nchw, w1, b1, w2, b2, *, kernel_size, group_size):
    B, C, H, W = x_nchw.shape
    K = kernel_size
    G = C // group_size
    Cg = C // G
    pad = K // 2

    # w1 (G,K,K,Cg,Cg) -> torch layout (O, I/G, K, K): O = g*Cg + co, I = ci
    w1_oihw = jnp.transpose(w1, (0, 4, 3, 1, 2)).reshape(C, Cg, K, K)
    y = lax.conv_general_dilated(
        x_nchw, w1_oihw, window_strides=(1, 1),
        padding=((pad, pad), (pad, pad)),
        dimension_numbers=("NCHW", "OIHW", "NCHW"),
        feature_group_count=G,
        precision=lax.Precision.HIGHEST)
    y = y + b1.reshape(1, C, 1, 1)

    # w2 (Ci, Co) -> (O, I, 1, 1)
    w2_oihw = jnp.transpose(w2, (1, 0)).reshape(C, C, 1, 1)
    z = lax.conv_general_dilated(
        y, w2_oihw, window_strides=(1, 1), padding=((0, 0), (0, 0)),
        dimension_numbers=("NCHW", "OIHW", "NCHW"),
        precision=lax.Precision.HIGHEST)
    return z + b2.reshape(1, C, 1, 1)


if __name__ == "__main__":
    # Small shapes consistent with the module: n_feat=8, kernel_size=3, group_size=4
    B, C, H, W = 2, 8, 16, 16
    kernel_size = 3
    group_size = 4
    G = C // group_size
    Cg = C // G

    key = jax.random.PRNGKey(0)
    kx, kw1, kb1, kw2, kb2 = jax.random.split(key, 5)

    x = jax.random.normal(kx, (B, C, H, W), dtype=jnp.float32)
    w1 = 0.1 * jax.random.normal(kw1, (G, kernel_size, kernel_size, Cg, Cg),
                                 dtype=jnp.float32)
    b1 = 0.1 * jax.random.normal(kb1, (1, C), dtype=jnp.float32)
    w2 = 0.1 * jax.random.normal(kw2, (C, C), dtype=jnp.float32)
    b2 = 0.1 * jax.random.normal(kb2, (1, C), dtype=jnp.float32)

    prepared = prepare_conv_group(w1, b1, w2, b2,
                                  kernel_size=kernel_size, group_size=group_size,
                                  height=H, width=W)

    out = conv_group_forward(x, prepared)
    out = jax.block_until_ready(out)

    ref = _reference(x, w1, b1, w2, b2,
                     kernel_size=kernel_size, group_size=group_size)
    ref = jax.block_until_ready(ref)

    assert out.shape == (B, C, H, W)
    max_err = float(jnp.max(jnp.abs(out - ref)))
    assert jnp.allclose(out, ref, atol=5e-4, rtol=5e-4), f"max abs err {max_err}"

    print("KERNEL_OK")
</pallas_src>

<mosaic_0001>
module attributes {stable_mosaic.version = 11 : i64} {
  func.func @_conv_group_fused_kernel(%arg0: i32, %arg1: memref<2x8x256xf32, #tpu.memory_space<vmem>>, %arg2: memref<8x72xf32, #tpu.memory_space<vmem>>, %arg3: memref<9x8x256xf32, #tpu.memory_space<vmem>>, %arg4: memref<8x1xf32, #tpu.memory_space<vmem>>, %arg5: memref<2x8x256xf32, #tpu.memory_space<vmem>>) attributes {dimension_semantics = [#tpu.dimension_semantics<parallel>], iteration_bounds = array<i64: 1>, scalar_prefetch = 0 : i64, scratch_operands = 0 : i64, tpu.core_type = #tpu.core_type<tc>, window_params = [{transform_indices = @transform_0, window_bounds = array<i64: 2, 8, 256>}, {pipeline_mode = #tpu.pipeline_mode<synchronous>, transform_indices = @transform_1, window_bounds = array<i64: 8, 72>}, {pipeline_mode = #tpu.pipeline_mode<synchronous>, transform_indices = @transform_2, window_bounds = array<i64: 9, 8, 256>}, {pipeline_mode = #tpu.pipeline_mode<synchronous>, transform_indices = @transform_3, window_bounds = array<i64: 8, 1>}, {transform_indices = @transform_4, window_bounds = array<i64: 2, 8, 256>}]} {
    %c0 = arith.constant 0 : index
    %c0_0 = arith.constant 0 : index
    %0 = vector.load %arg2[%c0, %c0_0] : memref<8x72xf32, #tpu.memory_space<vmem>>, vector<8x72xf32>
    %c0_1 = arith.constant 0 : index
    %c0_2 = arith.constant 0 : index
    %1 = vector.load %arg4[%c0_1, %c0_2] : memref<8x1xf32, #tpu.memory_space<vmem>>, vector<8x1xf32>
    %c0_3 = arith.constant 0 : index
    %c0_4 = arith.constant 0 : index
    %c0_5 = arith.constant 0 : index
    %2 = vector.load %arg1[%c0_3, %c0_4, %c0_5] : memref<2x8x256xf32, #tpu.memory_space<vmem>>, vector<1x8x256xf32>
    %3 = vector.shape_cast %2 : vector<1x8x256xf32> to vector<8x256xf32>
    %c17_i32 = arith.constant 17 : i32
    %4 = tpu.dynamic_rotate %3 by %c17_i32 dim 1 : vector<8x256xf32>, i32 -> vector<8x256xf32>
    %c0_6 = arith.constant 0 : index
    %c0_7 = arith.constant 0 : index
    %c0_8 = arith.constant 0 : index
    %5 = vector.load %arg3[%c0_6, %c0_7, %c0_8] : memref<9x8x256xf32, #tpu.memory_space<vmem>>, vector<1x8x256xf32>
    %6 = vector.shape_cast %5 : vector<1x8x256xf32> to vector<8x256xf32>
    %7 = arith.mulf %4, %6 : vector<8x256xf32>
    %c16_i32 = arith.constant 16 : i32
    %8 = tpu.dynamic_rotate %3 by %c16_i32 dim 1 : vector<8x256xf32>, i32 -> vector<8x256xf32>
    %c1 = arith.constant 1 : index
    %c0_9 = arith.constant 0 : index
    %c0_10 = arith.constant 0 : index
    %9 = vector.load %arg3[%c1, %c0_9, %c0_10] : memref<9x8x256xf32, #tpu.memory_space<vmem>>, vector<1x8x256xf32>
    %10 = vector.shape_cast %9 : vector<1x8x256xf32> to vector<8x256xf32>
    %11 = arith.mulf %8, %10 : vector<8x256xf32>
    %c15_i32 = arith.constant 15 : i32
    %12 = tpu.dynamic_rotate %3 by %c15_i32 dim 1 : vector<8x256xf32>, i32 -> vector<8x256xf32>
    %c2 = arith.constant 2 : index
    %c0_11 = arith.constant 0 : index
    %c0_12 = arith.constant 0 : index
    %13 = vector.load %arg3[%c2, %c0_11, %c0_12] : memref<9x8x256xf32, #tpu.memory_space<vmem>>, vector<1x8x256xf32>
    %14 = vector.shape_cast %13 : vector<1x8x256xf32> to vector<8x256xf32>
    %15 = arith.mulf %12, %14 : vector<8x256xf32>
    %c1_i32 = arith.constant 1 : i32
    %16 = tpu.dynamic_rotate %3 by %c1_i32 dim 1 : vector<8x256xf32>, i32 -> vector<8x256xf32>
    %c3 = arith.constant 3 : index
    %c0_13 = arith.constant 0 : index
    %c0_14 = arith.constant 0 : index
    %17 = vector.load %arg3[%c3, %c0_13, %c0_14] : memref<9x8x256xf32, #tpu.memory_space<vmem>>, vector<1x8x256xf32>
    %18 = vector.shape_cast %17 : vector<1x8x256xf32> to vector<8x256xf32>
    %19 = arith.mulf %16, %18 : vector<8x256xf32>
    %c4 = arith.constant 4 : index
    %c0_15 = arith.constant 0 : index
    %c0_16 = arith.constant 0 : index
    %20 = vector.load %arg3[%c4, %c0_15, %c0_16] : memref<9x8x256xf32, #tpu.memory_space<vmem>>, vector<1x8x256xf32>
    %21 = vector.shape_cast %20 : vector<1x8x256xf32> to vector<8x256xf32>
    %22 = arith.mulf %3, %21 : vector<8x256xf32>
    %c255_i32 = arith.constant 255 : i32
    %23 = tpu.dynamic_rotate %3 by %c255_i32 dim 1 : vector<8x256xf32>, i32 -> vector<8x256xf32>
    %c5 = arith.constant 5 : index
    %c0_17 = arith.constant 0 : index
    %c0_18 = arith.constant 0 : index
    %24 = vector.load %arg3[%c5, %c0_17, %c0_18] : memref<9x8x256xf32, #tpu.memory_space<vmem>>, vector<1x8x256xf32>
    %25 = vector.shape_cast %24 : vector<1x8x256xf32> to vector<8x256xf32>
    %26 = arith.mulf %23, %25 : vector<8x256xf32>
    %c241_i32 = arith.constant 241 : i32
    %27 = tpu.dynamic_rotate %3 by %c241_i32 dim 1 : vector<8x256xf32>, i32 -> vector<8x256xf32>
    %c6 = arith.constant 6 : index
    %c0_19 = arith.constant 0 : index
    %c0_20 = arith.constant 0 : index
    %28 = vector.load %arg3[%c6, %c0_19, %c0_20] : memref<9x8x256xf32, #tpu.memory_space<vmem>>, vector<1x8x256xf32>
    %29 = vector.shape_cast %28 : vector<1x8x256xf32> to vector<8x256xf32>
    %30 = arith.mulf %27, %29 : vector<8x256xf32>
    %c240_i32 = arith.constant 240 : i32
    %31 = tpu.dynamic_rotate %3 by %c240_i32 dim 1 : vector<8x256xf32>, i32 -> vector<8x256xf32>
    %c7 = arith.constant 7 : index
    %c0_21 = arith.constant 0 : index
    %c0_22 = arith.constant 0 : index
    %32 = vector.load %arg3[%c7, %c0_21, %c0_22] : memref<9x8x256xf32, #tpu.memory_space<vmem>>, vector<1x8x256xf32>
    %33 = vector.shape_cast %32 : vector<1x8x256xf32> to vector<8x256xf32>
    %34 = arith.mulf %31, %33 : vector<8x256xf32>
    %c239_i32 = arith.constant 239 : i32
    %35 = tpu.dynamic_rotate %3 by %c239_i32 dim 1 : vector<8x256xf32>, i32 -> vector<8x256xf32>
    %c8 = arith.constant 8 : index
    %c0_23 = arith.constant 0 : index
    %c0_24 = arith.constant 0 : index
    %36 = vector.load %arg3[%c8, %c0_23, %c0_24] : memref<9x8x256xf32, #tpu.memory_space<vmem>>, vector<1x8x256xf32>
    %37 = vector.shape_cast %36 : vector<1x8x256xf32> to vector<8x256xf32>
    %38 = arith.mulf %35, %37 : vector<8x256xf32>
    %39 = tpu.concatenate %7, %11, %15, %19, %22, %26, %30, %34, %38 in 0 : vector<8x256xf32>, vector<8x256xf32>, vector<8x256xf32>, vector<8x256xf32>, vector<8x256xf32>, vector<8x256xf32>, vector<8x256xf32>, vector<8x256xf32>, vector<8x256xf32> -> vector<72x256xf32>
    %cst = arith.constant dense<0.000000e+00> : vector<8x256xf32>
    %40 = tpu.matmul %0, %39, %cst {dimension_numbers = #tpu.dot_dimension_numbers<[1], [0], [0], [1], [0, 0, 1, 1], [], []>} : vector<8x72xf32>, vector<72x256xf32>, vector<8x256xf32> -> vector<8x256xf32>
    %41 = vector.broadcast %1 : vector<8x1xf32> to vector<8x256xf32>
    %42 = arith.addf %40, %41 : vector<8x256xf32>
    %c0_25 = arith.constant 0 : index
    %c0_26 = arith.constant 0 : index
    %c0_27 = arith.constant 0 : index
    %43 = vector.load %arg5[%c0_25, %c0_26, %c0_27] : memref<2x8x256xf32, #tpu.memory_space<vmem>>, vector<1x8x256xf32>
    %44 = vector.shape_cast %43 : vector<1x8x256xf32> to vector<8x256xf32>
    %45 = vector.shape_cast %42 : vector<8x256xf32> to vector<1x8x256xf32>
    tpu.vector_store %arg5[%c0_25, %c0_26, %c0_27], %45 {strides = array<i32>} : memref<2x8x256xf32, #tpu.memory_space<vmem>>, vector<1x8x256xf32>,
    %c1_28 = arith.constant 1 : index
    %c0_29 = arith.constant 0 : index
    %c0_30 = arith.constant 0 : index
    %46 = vector.load %arg1[%c1_28, %c0_29, %c0_30] : memref<2x8x256xf32, #tpu.memory_space<vmem>>, vector<1x8x256xf32>
    %47 = vector.shape_cast %46 : vector<1x8x256xf32> to vector<8x256xf32>
    %c17_i32_31 = arith.constant 17 : i32
    %48 = tpu.dynamic_rotate %47 by %c17_i32_31 dim 1 : vector<8x256xf32>, i32 -> vector<8x256xf32>
    %c0_32 = arith.constant 0 : index
    %c0_33 = arith.constant 0 : index
    %c0_34 = arith.constant 0 : index
    %49 = vector.load %arg3[%c0_32, %c0_33, %c0_34] : memref<9x8x256xf32, #tpu.memory_space<vmem>>, vector<1x8x256xf32>
    %50 = vector.shape_cast %49 : vector<1x8x256xf32> to vector<8x256xf32>
    %51 = arith.mulf %48, %50 : vector<8x256xf32>
    %c16_i32_35 = arith.constant 16 : i32
    %52 = tpu.dynamic_rotate %47 by %c16_i32_35 dim 1 : vector<8x256xf32>, i32 -> vector<8x256xf32>
    %c1_36 = arith.constant 1 : index
    %c0_37 = arith.constant 0 : index
    %c0_38 = arith.constant 0 : index
    %53 = vector.load %arg3[%c1_36, %c0_37, %c0_38] : memref<9x8x256xf32, #tpu.memory_space<vmem>>, vector<1x8x256xf32>
    %54 = vector.shape_cast %53 : vector<1x8x256xf32> to vector<8x256xf32>
    %55 = arith.mulf %52, %54 : vector<8x256xf32>
    %c15_i32_39 = arith.constant 15 : i32
    %56 = tpu.dynamic_rotate %47 by %c15_i32_39 dim 1 : vector<8x256xf32>, i32 -> vector<8x256xf32>
    %c2_40 = arith.constant 2 : index
    %c0_41 = arith.constant 0 : index
    %c0_42 = arith.constant 0 : index
    %57 = vector.load %arg3[%c2_40, %c0_41, %c0_42] : memref<9x8x256xf32, #tpu.memory_space<vmem>>, vector<1x8x256xf32>
    %58 = vector.shape_cast %57 : vector<1x8x256xf32> to vector<8x256xf32>
    %59 = arith.mulf %56, %58 : vector<8x256xf32>
    %c1_i32_43 = arith.constant 1 : i32
    %60 = tpu.dynamic_rotate %47 by %c1_i32_43 dim 1 : vector<8x256xf32>, i32 -> vector<8x256xf32>
    %c3_44 = arith.constant 3 : index
    %c0_45 = arith.constant 0 : index
    %c0_46 = arith.constant 0 : index
    %61 = vector.load %arg3[%c3_44, %c0_45, %c0_46] : memref<9x8x256xf32, #tpu.memory_space<vmem>>, vector<1x8x256xf32>
    %62 = vector.shape_cast %61 : vector<1x8x256xf32> to vector<8x256xf32>
    %63 = arith.mulf %60, %62 : vector<8x256xf32>
    %c4_47 = arith.constant 4 : index
    %c0_48 = arith.constant 0 : index
    %c0_49 = arith.constant 0 : index
    %64 = vector.load %arg3[%c4_47, %c0_48, %c0_49] : memref<9x8x256xf32, #tpu.memory_space<vmem>>, vector<1x8x256xf32>
    %65 = vector.shape_cast %64 : vector<1x8x256xf32> to vector<8x256xf32>
    %66 = arith.mulf %47, %65 : vector<8x256xf32>
    %c255_i32_50 = arith.constant 255 : i32
    %67 = tpu.dynamic_rotate %47 by %c255_i32_50 dim 1 : vector<8x256xf32>, i32 -> vector<8x256xf32>
    %c5_51 = arith.constant 5 : index
    %c0_52 = arith.constant 0 : index
    %c0_53 = arith.constant 0 : index
    %68 = vector.load %arg3[%c5_51, %c0_52, %c0_53] : memref<9x8x256xf32, #tpu.memory_space<vmem>>, vector<1x8x256xf32>
    %69 = vector.shape_cast %68 : vector<1x8x256xf32> to vector<8x256xf32>
    %70 = arith.mulf %67, %69 : vector<8x256xf32>
    %c241_i32_54 = arith.constant 241 : i32
    %71 = tpu.dynamic_rotate %47 by %c241_i32_54 dim 1 : vector<8x256xf32>, i32 -> vector<8x256xf32>
    %c6_55 = arith.constant 6 : index
    %c0_56 = arith.constant 0 : index
    %c0_57 = arith.constant 0 : index
    %72 = vector.load %arg3[%c6_55, %c0_56, %c0_57] : memref<9x8x256xf32, #tpu.memory_space<vmem>>, vector<1x8x256xf32>
    %73 = vector.shape_cast %72 : vector<1x8x256xf32> to vector<8x256xf32>
    %74 = arith.mulf %71, %73 : vector<8x256xf32>
    %c240_i32_58 = arith.constant 240 : i32
    %75 = tpu.dynamic_rotate %47 by %c240_i32_58 dim 1 : vector<8x256xf32>, i32 -> vector<8x256xf32>
    %c7_59 = arith.constant 7 : index
    %c0_60 = arith.constant 0 : index
    %c0_61 = arith.constant 0 : index
    %76 = vector.load %arg3[%c7_59, %c0_60, %c0_61] : memref<9x8x256xf32, #tpu.memory_space<vmem>>, vector<1x8x256xf32>
    %77 = vector.shape_cast %76 : vector<1x8x256xf32> to vector<8x256xf32>
    %78 = arith.mulf %75, %77 : vector<8x256xf32>
    %c239_i32_62 = arith.constant 239 : i32
    %79 = tpu.dynamic_rotate %47 by %c239_i32_62 dim 1 : vector<8x256xf32>, i32 -> vector<8x256xf32>
    %c8_63 = arith.constant 8 : index
    %c0_64 = arith.constant 0 : index
    %c0_65 = arith.constant 0 : index
    %80 = vector.load %arg3[%c8_63, %c0_64, %c0_65] : memref<9x8x256xf32, #tpu.memory_space<vmem>>, vector<1x8x256xf32>
    %81 = vector.shape_cast %80 : vector<1x8x256xf32> to vector<8x256xf32>
    %82 = arith.mulf %79, %81 : vector<8x256xf32>
    %83 = tpu.concatenate %51, %55, %59, %63, %66, %70, %74, %78, %82 in 0 : vector<8x256xf32>, vector<8x256xf32>, vector<8x256xf32>, vector<8x256xf32>, vector<8x256xf32>, vector<8x256xf32>, vector<8x256xf32>, vector<8x256xf32>, vector<8x256xf32> -> vector<72x256xf32>
    %cst_66 = arith.constant dense<0.000000e+00> : vector<8x256xf32>
    %84 = tpu.matmul %0, %83, %cst_66 {dimension_numbers = #tpu.dot_dimension_numbers<[1], [0], [0], [1], [0, 0, 1, 1], [], []>} : vector<8x72xf32>, vector<72x256xf32>, vector<8x256xf32> -> vector<8x256xf32>
    %85 = vector.broadcast %1 : vector<8x1xf32> to vector<8x256xf32>
    %86 = arith.addf %84, %85 : vector<8x256xf32>
    %c1_67 = arith.constant 1 : index
    %c0_68 = arith.constant 0 : index
    %c0_69 = arith.constant 0 : index
    %87 = vector.load %arg5[%c1_67, %c0_68, %c0_69] : memref<2x8x256xf32, #tpu.memory_space<vmem>>, vector<1x8x256xf32>
    %88 = vector.shape_cast %87 : vector<1x8x256xf32> to vector<8x256xf32>
    %89 = vector.shape_cast %86 : vector<8x256xf32> to vector<1x8x256xf32>
    tpu.vector_store %arg5[%c1_67, %c0_68, %c0_69], %89 {strides = array<i32>} : memref<2x8x256xf32, #tpu.memory_space<vmem>>, vector<1x8x256xf32>,
    return
  }
  func.func @transform_0(%arg0: i32) -> (i32, i32, i32) {
    %c0_i32 = arith.constant 0 : i32
    %c0_i32_0 = arith.constant 0 : i32
    %c0_i32_1 = arith.constant 0 : i32
    return %arg0, %c0_i32, %c0_i32_0 : i32, i32, i32
  }
  func.func @transform_1(%arg0: i32) -> (i32, i32) {
    %c0_i32 = arith.constant 0 : i32
    %c0_i32_0 = arith.constant 0 : i32
    %c0_i32_1 = arith.constant 0 : i32
    return %c0_i32, %c0_i32_0 : i32, i32
  }
  func.func @transform_2(%arg0: i32) -> (i32, i32, i32) {
    %c0_i32 = arith.constant 0 : i32
    %c0_i32_0 = arith.constant 0 : i32
    %c0_i32_1 = arith.constant 0 : i32
    %c0_i32_2 = arith.constant 0 : i32
    return %c0_i32, %c0_i32_0, %c0_i32_1 : i32, i32, i32
  }
  func.func @transform_3(%arg0: i32) -> (i32, i32) {
    %c0_i32 = arith.constant 0 : i32
    %c0_i32_0 = arith.constant 0 : i32
    %c0_i32_1 = arith.constant 0 : i32
    return %c0_i32, %c0_i32_0 : i32, i32
  }
  func.func @transform_4(%arg0: i32) -> (i32, i32, i32) {
    %c0_i32 = arith.constant 0 : i32
    %c0_i32_0 = arith.constant 0 : i32
    %c0_i32_1 = arith.constant 0 : i32
    return %arg0, %c0_i32, %c0_i32_0 : i32, i32, i32
  }
}

</mosaic_0001>

<bundles_post_ra>
// kernel: tpu_custom_call.1
= control target key start
LH: loop header
LB: loop body
LE: loop exit
PB: predicated region body
PF: predicated region fallthrough
CT: control target
= control target key end

     0   :  { %9 = vsyncpa [#allocation3], 0  ;;  %s746_s0 = inlined_call_operand.hbm [shape: f32[2,8,256], index: 0, kind: input, shape index: {}]   ;;  %s747_s1 = inlined_call_operand.vmem [shape: f32[8,72], index: 1, kind: input, shape index: {}]   ;;  %s748_s2 = inlined_call_operand.hbm [shape: f32[9,8,256], index: 2, kind: input, shape index: {}]   ;;  %s749_s3 = inlined_call_operand.vmem [shape: f32[8,1], index: 3, kind: input, shape index: {}]   ;;  %s750_s4 = inlined_call_operand.hbm [shape: f32[2,8,256], index: 4, kind: output, shape index: {}]  }
   0x1   :  { %10 = vsyncpa [#allocation6], 0 }
   0x2   :  { %11 = vsyncpa [#allocation4], 0  ;;  %s534_s15 = smov [#allocation2]   ;;  %s462_s19 = scalar_lea.hbm %s746_s0, 512 }
   0x3   :  { %s17_s16 = sshll.u32 %s534_s15, 4  ;;  %p463_p0 = scmp.ne.s32.totalorder %s746_s0, %s462_s19  ;;  %s18_s16 = int_to_ptr.vmem [resolvable:$true] %s17_s16 }
   0x4   :  { %p466_p1 = scmp.lt.u32.totalorder %s462_s19, %s746_s0 }
   0x6   :  { %p468_p2 = pnand %p466_p1, %p463_p0 }
   0x8   :  { %471 = shalt.err (!%p468_p2)
}
   0x9   :  { %s472_s24 = scalar_lea.vmem %s18_s16, 512  ;;  %p477_p4 = scmp.lt.s32.totalorder %s18_s16, %s18_s16 }
   0xa   :  { %p473_p3 = scmp.ne.s32.totalorder %s18_s16, %s472_s24  ;;  %p478_p5 = scmp.lt.s32.totalorder %s472_s24, %s472_s24 }
   0xc   :  { %p479_p6 = por %p478_p5, %p477_p4 }
   0xe   :  { %p480_p7 = pnand %p479_p6, %p473_p3 }
  0x10   :  { %483 = shalt.err (!%p480_p7)
}
  0x11   :  { %s535_s25 = smov 256   ;;  %s536_s26 = smov 16  }
  0x12   :  { %23 = dma.hbm_to_vmem [thread:$0]  %s746_s0, 512, %s18_s16, [#allocation3], %s535_s25, %s535_s25, %s536_s26  }
  0x13   :  { %s537_s29 = smov [#allocation5]   ;;  %s484_s7 = scalar_lea.hbm %s748_s2, 2304 }
  0x14   :  { %s31_s30 = sshll.u32 %s537_s29, 4  ;;  %p485_p8 = scmp.ne.s32.totalorder %s748_s2, %s484_s7  ;;  %s32_s30 = int_to_ptr.vmem [resolvable:$true] %s31_s30 }
  0x15   :  { %p488_p9 = scmp.lt.u32.totalorder %s484_s7, %s748_s2 }
  0x17   :  { %p490_p10 = pnand %p488_p9, %p485_p8 }
  0x19   :  { %493 = shalt.err (!%p490_p10)
}
  0x1a   :  { %s494_s12 = scalar_lea.vmem %s32_s30, 2304  ;;  %p499_p12 = scmp.lt.s32.totalorder %s32_s30, %s32_s30 }
  0x1b   :  { %p495_p11 = scmp.ne.s32.totalorder %s32_s30, %s494_s12  ;;  %p500_p13 = scmp.lt.s32.totalorder %s494_s12, %s494_s12 }
  0x1d   :  { %p501_p0 = por %p500_p13, %p499_p12 }
  0x1f   :  { %p502_p1 = pnand %p501_p0, %p495_p11 }
  0x21   :  { %505 = shalt.err (!%p502_p1)
}
  0x22   :  { %37 = dma.hbm_to_vmem [thread:$0]  %s748_s2, 2304, %s32_s30, [#allocation6], %s535_s25, %s535_s25, %s536_s26  }
  0x23   :  { %528 = dma.done.wait [#allocation3], 512  }
  0x24   :  { %529 = vsyncadd [#allocation3], 4294966784 }
  0x25   :  { %530 = dma.done.wait [#allocation6], 2304  }
  0x26   :  { %531 = vsyncadd [#allocation6], 4294964992  ;;  %v603_v0 = vld [vmem:[#allocation2] sm:$0xff]  ;;  %s538_s14 = smov 17   ;;  %v608_v1 = vld [vmem:[#allocation2 + $0x8] sm:$0xff]  ;;  %s539_s2 = smov 15   ;;  %v54_v7 = vlaneseq }
  0x27   :  { %63 = vrot.lane.b32.xlu1 %v603_v0, %s536_s26  ;;  %50 = vrot.lane.b32.xlu0 %v603_v0, %s538_s14  ;;  %v613_v2 = vld [vmem:[#allocation2 + $0x18] sm:$0xff]  ;;  %v615_v3 = vld [vmem:[#allocation2 + $0x10] sm:$0xff]  ;;  %s540_s15 = smov 1   ;;  %s541_s16 = smov 127   ;;  %v544_v4 = vmov 0.0   ;;  %v545_v5 = vmov 0  }
  0x28   :  { %s542_s17 = smov 113   ;;  %s543_s18 = smov 112   ;;  %225 = vmatprep.mubr.f32.mxu0 %v544_v4  ;;  %385 = vmatprep.mubr.f32.mxu1 %v544_v4  ;;  %v47_v6 = vld [vmem:[%s749_s3] sm:$0xff]  ;;  %v650_v8 = vand.u32 127, %v54_v7  ;;  %v71_v11 = vld [vmem:[#allocation5 + $0x10] sm:$0xff]  ;;  %v60_v13 = vld [vmem:[#allocation5 + $0x8] sm:$0xff] }
  0x29   :  { %461 = vset.pattern.permute.xlu0 %v545_v5  ;;  %s546_s19 = smov 111   ;;  %v59_v12 = vld [vmem:[#allocation5] sm:$0xff]  ;;  %v72_v14 = vld [vmem:[#allocation5 + $0x18] sm:$0xff]  ;;  %v84_v44 = vld [vmem:[#allocation5 + $0x28] sm:$0xff]  ;;  %vm157_vm8 = vcmask 588800  }
  0x2a   :  { %vm67_vm0 = vcmp.lt.s32.totalorder %v650_v8, 16  ;;  %vm56_vm1 = vcmp.lt.s32.totalorder %v650_v8, 17  ;;  %vm79_vm2 = vcmp.lt.s32.totalorder %v650_v8, 15  ;;  %v83_v43 = vld [vmem:[#allocation5 + $0x20] sm:$0xff]  ;;  %vm91_vm3 = vcmp.lt.s32.totalorder %v650_v8, 1  ;;  %v95_v47 = vld [vmem:[#allocation5 + $0x30] sm:$0xff] }
  0x2b   :  { %65 = vrot.lane.b32.xlu1 %v608_v1, %s536_s26  ;;  %52 = vrot.lane.b32.xlu0 %v608_v1, %s538_s14  ;;  %v96_v48 = vld [vmem:[#allocation5 + $0x38] sm:$0xff]  ;;  %vm108_vm4 = vcmp.lt.s32.totalorder %v650_v8, 127  ;;  %v101_v7 = vld [vmem:[#allocation5 + $0x48] sm:$0xff]  ;;  %vm120_vm5 = vcmp.lt.s32.totalorder %v650_v8, 113  ;;  %vm132_vm6 = vcmp.lt.s32.totalorder %v650_v8, 112  ;;  %vm144_vm7 = vcmp.lt.s32.totalorder %v650_v8, 111 }
  0x2f   :  { %239 = vrot.lane.b32.xlu1 %v613_v2, %s538_s14  ;;  %237 = vrot.lane.b32.xlu0 %v615_v3, %s538_s14 }
  0x33   :  { %249 = vrot.lane.b32.xlu1 %v613_v2, %s536_s26  ;;  %247 = vrot.lane.b32.xlu0 %v615_v3, %s536_s26 }
  0x37   :  { %77 = vrot.lane.b32.xlu1 %v608_v1, %s539_s2  ;;  %75 = vrot.lane.b32.xlu0 %v603_v0, %s539_s2 }
  0x3b   :  { %89 = vrot.lane.b32.xlu1 %v608_v1, %s540_s15  ;;  %87 = vrot.lane.b32.xlu0 %v603_v0, %s540_s15 }
  0x3f   :  { %259 = vrot.lane.b32.xlu1 %v613_v2, %s539_s2  ;;  %257 = vrot.lane.b32.xlu0 %v615_v3, %s539_s2 }
  0x43   :  { %269 = vrot.lane.b32.xlu1 %v613_v2, %s540_s15  ;;  %267 = vrot.lane.b32.xlu0 %v615_v3, %s540_s15 }
  0x47   :  { %106 = vrot.lane.b32.xlu1 %v608_v1, %s541_s16  ;;  %104 = vrot.lane.b32.xlu0 %v603_v0, %s541_s16 }
  0x4b   :  { %283 = vrot.lane.b32.xlu1 %v613_v2, %s541_s16  ;;  %281 = vrot.lane.b32.xlu0 %v615_v3, %s541_s16 }
  0x4f   :  { %118 = vrot.lane.b32.xlu1 %v608_v1, %s542_s17  ;;  %116 = vrot.lane.b32.xlu0 %v603_v0, %s542_s17 }
  0x53   :  { %130 = vrot.lane.b32.xlu1 %v608_v1, %s543_s18  ;;  %128 = vrot.lane.b32.xlu0 %v603_v0, %s543_s18 }
  0x57   :  { %293 = vrot.lane.b32.xlu1 %v613_v2, %s542_s17  ;;  %291 = vrot.lane.b32.xlu0 %v615_v3, %s542_s17 }
  0x5b   :  { %303 = vrot.lane.b32.xlu1 %v613_v2, %s543_s18  ;;  %301 = vrot.lane.b32.xlu0 %v615_v3, %s543_s18 }
  0x5f   :  { %142 = vrot.lane.b32.xlu1 %v608_v1, %s546_s19  ;;  %140 = vrot.lane.b32.xlu0 %v603_v0, %s546_s19 }
  0x63   :  { %313 = vrot.lane.b32.xlu1 %v613_v2, %s546_s19  ;;  %311 = vrot.lane.b32.xlu0 %v615_v3, %s546_s19 }
  0x67   :  { %154 = vperm.xlu0 %461, %v47_v6  }
  0x99   :  { %v64_v9 = vpop.permute.xlu1 %63  ;;  %v51_v10 = vpop.permute.xlu0 %50 }
  0x9d   :  { %v66_v15 = vpop.permute.xlu1 %65  ;;  %v53_v16 = vpop.permute.xlu0 %52 }
  0x9e   :  { %v68_v17 = vsel %vm67_vm0, %v64_v9, %v66_v15  ;;  %v69_v18 = vsel %vm67_vm0, %v66_v15, %v64_v9  ;;  %v57_v19 = vsel %vm56_vm1, %v51_v10, %v53_v16  ;;  %v58_v20 = vsel %vm56_vm1, %v53_v16, %v51_v10  ;;  %v100_v9 = vld [vmem:[#allocation5 + $0x40] sm:$0xff]  ;;  %v113_v15 = vld [vmem:[#allocation5 + $0x58] sm:$0xff] }
  0x9f   :  { %v73_v21 = vmul.f32 %v71_v11, %v69_v18  ;;  %v61_v22 = vmul.f32 %v59_v12, %v58_v20  ;;  %v62_v23 = vmul.f32 %v60_v13, %v57_v19  ;;  %v74_v24 = vmul.f32 %v72_v14, %v68_v17 }
  0xa0   :  { %v103_v20 = vmul.f32 %v101_v7, %v608_v1  ;;  %v279_v1 = vmul.f32 %v615_v3, %v100_v9 }
  0xa1   :  { %v240_v25 = vpop.permute.xlu1 %239  ;;  %v238_v26 = vpop.permute.xlu0 %237  ;;  %v415_v27 = vpack.c.bf16 %v74_v24, %v62_v23  ;;  %v417_v28 = vpack.c.bf16 %v73_v21, %v61_v22  ;;  %v102_v21 = vmul.f32 %v100_v9, %v603_v0 }
  0xa2   :  { %v241_v29 = vsel %vm56_vm1, %v238_v26, %v240_v25  ;;  %v242_v30 = vsel %vm56_vm1, %v240_v25, %v238_v26 }
  0xa3   :  { %416 = vmatprep.subr.bf16.mxu0 %v415_v27  ;;  %v245_v35 = vmul.f32 %v242_v30, %v59_v12  ;;  %v246_v37 = vmul.f32 %v241_v29, %v60_v13  ;;  %v280_v30 = vmul.f32 %v613_v2, %v101_v7  ;;  %v125_v2 = vld [vmem:[#allocation5 + $0x68] sm:$0xff] }
  0xa4   :  { %418 = vmatpush1.bf16.msra.mxu0 %v417_v28 }
  0xa5   :  { %v250_v31 = vpop.permute.xlu1 %249  ;;  %v248_v32 = vpop.permute.xlu0 %247 }
  0xa6   :  { %v251_v33 = vsel %vm67_vm0, %v248_v32, %v250_v31  ;;  %v252_v34 = vsel %vm67_vm0, %v250_v31, %v248_v32 }
  0xa7   :  { %v255_v36 = vmul.f32 %v252_v34, %v71_v11  ;;  %v256_v38 = vmul.f32 %v251_v33, %v72_v14  ;;  %v112_v14 = vld [vmem:[#allocation5 + $0x50] sm:$0xff] }
  0xa9   :  { %v78_v39 = vpop.permute.xlu1 %77  ;;  %v76_v40 = vpop.permute.xlu0 %75  ;;  %v431_v41 = vpack.c.bf16 %v256_v38, %v246_v37  ;;  %v433_v42 = vpack.c.bf16 %v255_v36, %v245_v35  ;;  %v124_v38 = vld [vmem:[#allocation5 + $0x60] sm:$0xff] }
  0xaa   :  { %v80_v45 = vsel %vm79_vm2, %v76_v40, %v78_v39  ;;  %v81_v46 = vsel %vm79_vm2, %v78_v39, %v76_v40  ;;  %v136_v40 = vld [vmem:[#allocation5 + $0x70] sm:$0xff] }
  0xab   :  { %432 = vmatprep.subr.bf16.mxu1 %v431_v41  ;;  %v85_v53 = vmul.f32 %v83_v43, %v81_v46  ;;  %v86_v54 = vmul.f32 %v84_v44, %v80_v45  ;;  %v137_v41 = vld [vmem:[#allocation5 + $0x78] sm:$0xff] }
  0xac   :  { %434 = vmatpush1.bf16.msra.mxu1 %v433_v42 }
  0xad   :  { %v90_v49 = vpop.permute.xlu1 %89  ;;  %v88_v50 = vpop.permute.xlu0 %87 }
  0xae   :  { %v92_v51 = vsel %vm91_vm3, %v88_v50, %v90_v49  ;;  %v93_v52 = vsel %vm91_vm3, %v90_v49, %v88_v50 }
  0xaf   :  { %v97_v55 = vmul.f32 %v95_v47, %v93_v52  ;;  %v98_v56 = vmul.f32 %v96_v48, %v92_v51 }
  0xb1   :  { %v260_v57 = vpop.permute.xlu1 %259  ;;  %v258_v58 = vpop.permute.xlu0 %257  ;;  %v419_v59 = vpack.c.bf16 %v98_v56, %v86_v54  ;;  %v421_v60 = vpack.c.bf16 %v97_v55, %v85_v53 }
  0xb2   :  { %v261_v61 = vsel %vm79_vm2, %v258_v58, %v260_v57  ;;  %v262_v62 = vsel %vm79_vm2, %v260_v57, %v258_v58 }
  0xb3   :  { %420 = vmatprep.subr.bf16.mxu0 %v419_v59  ;;  %v265_v10 = vmul.f32 %v262_v62, %v83_v43  ;;  %v266_v11 = vmul.f32 %v261_v61, %v84_v44 }
  0xb4   :  { %422 = vmatpush1.bf16.msra.mxu0 %v421_v60 }
  0xb5   :  { %v270_v63 = vpop.permute.xlu1 %269  ;;  %v268_v4 = vpop.permute.xlu0 %267 }
  0xb6   :  { %v271_v5 = vsel %vm91_vm3, %v268_v4, %v270_v63  ;;  %v272_v6 = vsel %vm91_vm3, %v270_v63, %v268_v4  ;;  %v148_v4 = vld [vmem:[#allocation5 + $0x80] sm:$0xff] }
  0xb7   :  { %v275_v12 = vmul.f32 %v272_v6, %v95_v47  ;;  %v276_v13 = vmul.f32 %v271_v5, %v96_v48  ;;  %v149_v5 = vld [vmem:[#allocation5 + $0x88] sm:$0xff] }
  0xb9   :  { %v107_v16 = vpop.permute.xlu1 %106  ;;  %v105_v17 = vpop.permute.xlu0 %104  ;;  %v435_v18 = vpack.c.bf16 %v276_v13, %v266_v11  ;;  %v437_v19 = vpack.c.bf16 %v275_v12, %v265_v10 }
  0xba   :  { %v109_v22 = vsel %vm108_vm4, %v105_v17, %v107_v16  ;;  %v110_v23 = vsel %vm108_vm4, %v107_v16, %v105_v17 }
  0xbb   :  { %v114_v24 = vmul.f32 %v112_v14, %v109_v22  ;;  %v115_v25 = vmul.f32 %v113_v15, %v110_v23  ;;  %436 = vmatprep.subr.bf16.mxu1 %v435_v18 }
  0xbc   :  { %438 = vmatpush1.bf16.msra.mxu1 %v437_v19 }
  0xbd   :  { %v284_v26 = vpop.permute.xlu1 %283  ;;  %v282_v27 = vpop.permute.xlu0 %281  ;;  %v423_v28 = vpack.c.bf16 %v115_v25, %v103_v20  ;;  %v425_v29 = vpack.c.bf16 %v114_v24, %v102_v21 }
  0xbe   :  { %v285_v0 = vsel %vm108_vm4, %v282_v27, %v284_v26  ;;  %v286_v31 = vsel %vm108_vm4, %v284_v26, %v282_v27 }
  0xbf   :  { %v289_v32 = vmul.f32 %v285_v0, %v112_v14  ;;  %v290_v33 = vmul.f32 %v286_v31, %v113_v15  ;;  %424 = vmatprep.subr.bf16.mxu0 %v423_v28  ;;  %v46_v15 = vld [vmem:[%s747_s1] sm:$0xff]  ;;  %s547_s1 = smov [#allocation7]  }
  0xc0   :  { %426 = vmatpush1.bf16.msra.mxu0 %v425_v29  ;;  %s400_s23 = sshll.u32 %s547_s1, 4  ;;  %s401_s23 = int_to_ptr.vmem [resolvable:$true] %s400_s23 }
  0xc1   :  { %v119_v34 = vpop.permute.xlu1 %118  ;;  %v117_v35 = vpop.permute.xlu0 %116  ;;  %v439_v36 = vpack.c.bf16 %v290_v33, %v280_v30  ;;  %v441_v37 = vpack.c.bf16 %v289_v32, %v279_v1  ;;  %s506_s24 = scalar_lea.vmem %s401_s23, 512  ;;  %p511_p3 = scmp.lt.s32.totalorder %s401_s23, %s401_s23 }
  0xc2   :  { %v121_v3 = vsel %vm120_vm5, %v117_v35, %v119_v34  ;;  %v122_v39 = vsel %vm120_vm5, %v119_v34, %v117_v35  ;;  %p507_p2 = scmp.ne.s32.totalorder %s401_s23, %s506_s24  ;;  %p512_p4 = scmp.lt.s32.totalorder %s506_s24, %s506_s24 }
  0xc3   :  { %440 = vmatprep.subr.bf16.mxu1 %v439_v36  ;;  %v126_v46 = vmul.f32 %v124_v38, %v121_v3  ;;  %v127_v47 = vmul.f32 %v125_v2, %v122_v39 }
  0xc4   :  { %442 = vmatpush1.bf16.msra.mxu1 %v441_v37  ;;  %p513_p5 = por %p512_p4, %p511_p3 }
  0xc5   :  { %v131_v42 = vpop.permute.xlu1 %130  ;;  %v129_v43 = vpop.permute.xlu0 %128 }
  0xc6   :  { %v133_v44 = vsel %vm132_vm6, %v129_v43, %v131_v42  ;;  %v134_v45 = vsel %vm132_vm6, %v131_v42, %v129_v43  ;;  %p514_p6 = pnand %p513_p5, %p507_p2 }
  0xc7   :  { %v138_v48 = vmul.f32 %v136_v40, %v133_v44  ;;  %v139_v49 = vmul.f32 %v137_v41, %v134_v45 }
  0xc9   :  { %v294_v50 = vpop.permute.xlu1 %293  ;;  %v292_v51 = vpop.permute.xlu0 %291  ;;  %v427_v52 = vpack.c.bf16 %v139_v49, %v127_v47  ;;  %v429_v53 = vpack.c.bf16 %v138_v48, %v126_v46 }
  0xca   :  { %v295_v54 = vsel %vm120_vm5, %v292_v51, %v294_v50  ;;  %v296_v55 = vsel %vm120_vm5, %v294_v50, %v292_v51 }
  0xcb   :  { %428 = vmatprep.subr.bf16.mxu0 %v427_v52  ;;  %v299_v60 = vmul.f32 %v295_v54, %v124_v38  ;;  %v300_v61 = vmul.f32 %v296_v55, %v125_v2 }
  0xcc   :  { %430 = vmatpush1.bf16.msra.mxu0 %v429_v53 }
  0xcd   :  { %v304_v56 = vpop.permute.xlu1 %303  ;;  %v302_v57 = vpop.permute.xlu0 %301 }
  0xce   :  { %v305_v58 = vsel %vm132_vm6, %v302_v57, %v304_v56  ;;  %v306_v59 = vsel %vm132_vm6, %v304_v56, %v302_v57 }
  0xcf   :  { %v309_v62 = vmul.f32 %v305_v58, %v136_v40  ;;  %v310_v63 = vmul.f32 %v306_v59, %v137_v41 }
  0xd1   :  { %v143_v6 = vpop.permute.xlu1 %142  ;;  %v141_v7 = vpop.permute.xlu0 %140  ;;  %v443_v9 = vpack.c.bf16 %v310_v63, %v300_v61  ;;  %v445_v10 = vpack.c.bf16 %v309_v62, %v299_v60 }
  0xd2   :  { %v145_v11 = vsel %vm144_vm7, %v141_v7, %v143_v6  ;;  %v146_v12 = vsel %vm144_vm7, %v143_v6, %v141_v7 }
  0xd3   :  { %v150_v13 = vmul.f32 %v148_v4, %v145_v11  ;;  %v151_v14 = vmul.f32 %v149_v5, %v146_v12  ;;  %444 = vmatprep.subr.bf16.mxu1 %v443_v9 }
  0xd4   :  { %446 = vmatpush1.bf16.msra.mxu1 %v445_v10 }
  0xd5   :  { %v314_v16 = vpop.permute.xlu1 %313  ;;  %v312_v17 = vpop.permute.xlu0 %311  ;;  %177 = vmatprep.subr.mxu0 %v151_v14 }
  0xd6   :  { %v315_v18 = vsel %vm144_vm7, %v312_v17, %v314_v16  ;;  %v316_v19 = vsel %vm144_vm7, %v314_v16, %v312_v17  ;;  %178 = vmatpush1.msra.mxu0 %v150_v13 }
  0xd7   :  { %v319_v20 = vmul.f32 %v315_v18, %v148_v4  ;;  %v320_v21 = vmul.f32 %v316_v19, %v149_v5  ;;  %413 = vmatmul.mubr.msk.f32.vlgmr.msra.gmra.mrb[0].mxu0 %vm157_vm8, %v46_v15 }
  0xd9   :  { %337 = vmatprep.subr.mxu1 %v320_v21 }
  0xda   :  { %338 = vmatpush1.msra.mxu1 %v319_v20 }
  0xdb   :  { %414 = vmatmul.mubr.msk.f32.vlgmr.msra.gmra.mrb[0].mxu1 %vm157_vm8, %v46_v15 }
  0xe6   :  { %v155_v22 = vpop.permute.xlu0 %154 }
 0x1aa   :  { %v227_v23 = vpop.f32.mrb[0].mxu0 }
 0x1ab   :  { %v228_v24 = vadd.f32 %v227_v23, %v155_v22  ;;  %v229_v25 = vpop.f32.mrb[1].mxu0 }
 0x1ac   :  { %v230_v26 = vadd.f32 %v229_v25, %v155_v22 }
 0x1ad   :  { %232 = vst [vmem:[#allocation7] sm:$0xff] %v228_v24 }
 0x1ae   :  { %233 = vst [vmem:[#allocation7 + $0x8] sm:$0xff] %v230_v26  ;;  %v387_v27 = vpop.f32.mrb[0].mxu1 }
 0x1af   :  { %v388_v28 = vadd.f32 %v387_v27, %v155_v22  ;;  %v389_v8 = vpop.f32.mrb[1].mxu1 }
 0x1b0   :  { %v390_v29 = vadd.f32 %v389_v8, %v155_v22 }
 0x1b1   :  { %393 = vst [vmem:[#allocation7 + $0x10] sm:$0xff] %v388_v28 }
 0x1b2   :  { %394 = vst [vmem:[#allocation7 + $0x18] sm:$0xff] %v390_v29 }
 0x1b3   :  { %517 = shalt.err (!%p514_p6)
}
 0x1b4   :  { %s518_s29 = scalar_lea.hbm %s750_s4, 512 }
 0x1b5   :  { %p519_p7 = scmp.ne.s32.totalorder %s750_s4, %s518_s29  ;;  %p522_p8 = scmp.lt.u32.totalorder %s518_s29, %s750_s4 }
 0x1b7   :  { %p524_p9 = pnand %p522_p8, %p519_p7 }
 0x1b9   :  { %527 = shalt.err (!%p524_p9)
}
 0x1ba   :  { %406 = dma.vmem_to_hbm [thread:$0]  %s401_s23, 512, %s750_s4, [#allocation4], %s535_s25, %s535_s25, %s536_s26  }
 0x1bb   :  { %532 = dma.done.wait [#allocation4], 512  }
 0x1bc   :  { %533 = vsyncadd [#allocation4], 4294966784 }
 0x1bd   :  { %410 = vsyncpa [#allocation3], 1 }
 0x1be   :  { %411 = vsyncpa [#allocation6], 1 }
 0x1bf   :  { %412 = vsyncpa [#allocation4], 1 }

</bundles_post_ra>
